<compile_context>
chip_gen: v7x
topology: tpu7x:2x2x1
jax: 0.10.0
libtpu: 0.0.40
codegen_flags: <defaults>
</compile_context>

<pallas_src>
import functools

import jax
import jax.numpy as jnp
from jax.experimental import pallas as pl
from jax.experimental.pallas import tpu as pltpu

H1 = 512
H2 = 256


def _round_up(n, m):
    return ((n + m - 1) // m) * m


def _choose_batch_tiling(B):
    """Pick (TB, B_pad): >=2 grid steps for B>=16 (v7x megacore), TB<=~512."""
    B8 = _round_up(B, 8)
    if B8 <= 8:
        return B8, B8                       # single tiny tile, nothing to split
    n_steps = max(2, -(-B8 // 512))         # at least 2 steps, tiles <= ~512 rows
    TB = _round_up(-(-B8 // n_steps), 8)    # ceil(B8 / n_steps), rounded to 8
    B_pad = _round_up(B8, TB)
    return TB, B_pad


def _dqn_mlp_kernel(x_ref, w1_ref, b1_ref, w2_ref, b2_ref, w3_ref, b3_ref,
                    o_ref):
    # Fused cast: x arrives f32 straight from HBM; bf16 cast rides the idle
    # VPU slot under the MXU work.
    x = x_ref[...].astype(jnp.bfloat16)
    # Layer 1: Linear(input_dim, 512) + ReLU  (bf16 dot, f32 accumulate + bias)
    h1 = jnp.dot(x, w1_ref[...], preferred_element_type=jnp.float32)
    h1 = jnp.maximum(h1 + b1_ref[...], 0.0).astype(jnp.bfloat16)
    # Layer 2: Linear(512, 256) + ReLU
    h2 = jnp.dot(h1, w2_ref[...], preferred_element_type=jnp.float32)
    h2 = jnp.maximum(h2 + b2_ref[...], 0.0).astype(jnp.bfloat16)
    # Layer 3: Linear(256, out_pad)  (no activation)
    out = jnp.dot(h2, w3_ref[...], preferred_element_type=jnp.float32)
    o_ref[...] = (out + b3_ref[...]).astype(o_ref.dtype)


def pack_dqn_params(params, output_dim):
    """One-time weight packing (do NOT call per forward step).

    Input params are (in, out)-layout f32 weights and (1, out) biases.
    Produces bf16 matmul operands, f32 biases, with the final projection
    zero-padded to a lane-dense multiple of 128 columns.
    """
    n_pad = _round_up(output_dim, 128)
    packed = {
        "w1": params["w1"].astype(jnp.bfloat16),
        "b1": params["b1"].astype(jnp.float32),
        "w2": params["w2"].astype(jnp.bfloat16),
        "b2": params["b2"].astype(jnp.float32),
        "w3": jnp.zeros((H2, n_pad), jnp.bfloat16).at[:, :output_dim].set(
            params["w3"].astype(jnp.bfloat16)),
        "b3": jnp.zeros((1, n_pad), jnp.float32).at[:, :output_dim].set(
            params["b3"].astype(jnp.float32)),
    }
    return jax.tree_util.tree_map(jnp.asarray, packed)


@functools.partial(jax.jit, static_argnames=("out_dim",))
def dqn_forward(x, packed, out_dim):
    """Fused DQN MLP forward pass.

    x: (B, input_dim) float32
    packed: output of pack_dqn_params (bf16 weights, f32 biases, padded w3/b3)
    Returns: (B, out_dim) float32.
    """
    w1, b1 = packed["w1"], packed["b1"]
    w2, b2 = packed["w2"], packed["b2"]
    w3, b3 = packed["w3"], packed["b3"]

    B, K = x.shape
    N_pad = w3.shape[1]

    TB, B_pad = _choose_batch_tiling(B)
    if B_pad != B:
        x = jnp.pad(x, ((0, B_pad - B), (0, 0)))

    const = lambda a: pl.BlockSpec(a.shape, lambda i: (0,) * a.ndim)

    out_padded = pl.pallas_call(
        _dqn_mlp_kernel,
        out_shape=jax.ShapeDtypeStruct((B_pad, N_pad), jnp.float32),
        grid_spec=pltpu.PrefetchScalarGridSpec(
            num_scalar_prefetch=0,
            grid=(B_pad // TB,),
            in_specs=[
                pl.BlockSpec((TB, K), lambda i: (i, 0)),  # x tile (f32, unpadded K)
                const(w1), const(b1),                      # resident weights
                const(w2), const(b2),
                const(w3), const(b3),
            ],
            out_specs=pl.BlockSpec((TB, N_pad), lambda i: (i, 0)),
        ),
        compiler_params=pltpu.CompilerParams(
            dimension_semantics=("parallel",)),
    )(x, w1, b1, w2, b2, w3, b3)

    return out_padded[:B, :out_dim]


def init_dqn_params(key, input_dim, output_dim):
    """Deterministic synthetic init (PyTorch-like uniform fan-in scaling)."""
    ks = jax.random.split(key, 6)

    def linear(kw, kb, fan_in, fan_out):
        bound = 1.0 / jnp.sqrt(jnp.float32(fan_in))
        # Stored directly as (in, out) — equivalent to PyTorch's (out, in)^T.
        w = jax.random.uniform(kw, (fan_in, fan_out), jnp.float32,
                               minval=-bound, maxval=bound)
        b = jax.random.uniform(kb, (1, fan_out), jnp.float32,
                               minval=-bound, maxval=bound)
        return w, b

    w1, b1 = linear(ks[0], ks[1], input_dim, H1)
    w2, b2 = linear(ks[2], ks[3], H1, H2)
    w3, b3 = linear(ks[4], ks[5], H2, output_dim)
    return {"w1": w1, "b1": b1, "w2": w2, "b2": b2, "w3": w3, "b3": b3}


def dqn_reference(x, params):
    h1 = jnp.maximum(x @ params["w1"] + params["b1"], 0.0)
    h2 = jnp.maximum(h1 @ params["w2"] + params["b2"], 0.0)
    return h2 @ params["w3"] + params["b3"]


if __name__ == "__main__":
    key = jax.random.PRNGKey(0)
    k_params, k_x1, k_x2 = jax.random.split(key, 3)

    input_dim = 64      # e.g. flattened observation vector
    output_dim = 8      # number of discrete actions
    params = init_dqn_params(k_params, input_dim, output_dim)
    packed = pack_dqn_params(params, output_dim)   # packed ONCE, reused per call

    # Small inference-style batch (B=8 -> single 8-row tile).
    x_small = jax.random.normal(k_x1, (8, input_dim), jnp.float32)
    out_small = jax.block_until_ready(dqn_forward(x_small, packed, output_dim))
    ref_small = dqn_reference(x_small, params)
    assert out_small.shape == (8, output_dim), out_small.shape
    assert jnp.allclose(out_small, ref_small, atol=3e-2, rtol=3e-2), \
        float(jnp.max(jnp.abs(out_small - ref_small)))

    # Replay-style batch: B=192 -> TB=96, B_pad=192, grid=(2,) "parallel"
    # (both v7x TensorCores busy, zero batch-padding waste).
    x_big = jax.random.normal(k_x2, (192, input_dim), jnp.float32)
    out_big = jax.block_until_ready(dqn_forward(x_big, packed, output_dim))
    ref_big = dqn_reference(x_big, params)
    assert out_big.shape == (192, output_dim), out_big.shape
    assert jnp.allclose(out_big, ref_big, atol=3e-2, rtol=3e-2), \
        float(jnp.max(jnp.abs(out_big - ref_big)))

    print("KERNEL_OK")
</pallas_src>

<mosaic_0001>
module attributes {stable_mosaic.version = 11 : i64} {
  func.func @_dqn_mlp_kernel(%arg0: i32, %arg1: memref<8x64xf32, #tpu.memory_space<vmem>>, %arg2: memref<64x512xbf16, #tpu.memory_space<vmem>>, %arg3: memref<1x512xf32, #tpu.memory_space<vmem>>, %arg4: memref<512x256xbf16, #tpu.memory_space<vmem>>, %arg5: memref<1x256xf32, #tpu.memory_space<vmem>>, %arg6: memref<256x128xbf16, #tpu.memory_space<vmem>>, %arg7: memref<1x128xf32, #tpu.memory_space<vmem>>, %arg8: memref<8x128xf32, #tpu.memory_space<vmem>>) attributes {dimension_semantics = [#tpu.dimension_semantics<parallel>], iteration_bounds = array<i64: 1>, scalar_prefetch = 0 : i64, scratch_operands = 0 : i64, tpu.core_type = #tpu.core_type<tc>, window_params = [{transform_indices = @transform_0, window_bounds = array<i64: 8, 64>}, {pipeline_mode = #tpu.pipeline_mode<synchronous>, transform_indices = @transform_1, window_bounds = array<i64: 64, 512>}, {pipeline_mode = #tpu.pipeline_mode<synchronous>, transform_indices = @transform_2, window_bounds = array<i64: 1, 512>}, {pipeline_mode = #tpu.pipeline_mode<synchronous>, transform_indices = @transform_3, window_bounds = array<i64: 512, 256>}, {pipeline_mode = #tpu.pipeline_mode<synchronous>, transform_indices = @transform_4, window_bounds = array<i64: 1, 256>}, {pipeline_mode = #tpu.pipeline_mode<synchronous>, transform_indices = @transform_5, window_bounds = array<i64: 256, 128>}, {pipeline_mode = #tpu.pipeline_mode<synchronous>, transform_indices = @transform_6, window_bounds = array<i64: 1, 128>}, {transform_indices = @transform_7, window_bounds = array<i64: 8, 128>}]} {
    %c0 = arith.constant 0 : index
    %c0_0 = arith.constant 0 : index
    %0 = vector.load %arg1[%c0, %c0_0] : memref<8x64xf32, #tpu.memory_space<vmem>>, vector<8x64xf32>
    %1 = arith.truncf %0 : vector<8x64xf32> to vector<8x64xbf16>
    %c0_1 = arith.constant 0 : index
    %c0_2 = arith.constant 0 : index
    %2 = vector.load %arg2[%c0_1, %c0_2] : memref<64x512xbf16, #tpu.memory_space<vmem>>, vector<64x512xbf16>
    %cst = arith.constant dense<0.000000e+00> : vector<8x512xf32>
    %3 = tpu.matmul %1, %2, %cst {dimension_numbers = #tpu.dot_dimension_numbers<[1], [0], [0], [1], [0, 0, 1, 1], [], []>} : vector<8x64xbf16>, vector<64x512xbf16>, vector<8x512xf32> -> vector<8x512xf32>
    %c0_3 = arith.constant 0 : index
    %c0_4 = arith.constant 0 : index
    %4 = vector.load %arg3[%c0_3, %c0_4] : memref<1x512xf32, #tpu.memory_space<vmem>>, vector<1x512xf32>
    %5 = vector.broadcast %4 : vector<1x512xf32> to vector<8x512xf32>
    %6 = arith.addf %3, %5 : vector<8x512xf32>
    %cst_5 = arith.constant 0.000000e+00 : f32
    %7 = vector.broadcast %cst_5 : f32 to vector<8x512xf32>
    %8 = arith.maximumf %6, %7 : vector<8x512xf32>
    %9 = arith.truncf %8 : vector<8x512xf32> to vector<8x512xbf16>
    %c0_6 = arith.constant 0 : index
    %c0_7 = arith.constant 0 : index
    %10 = vector.load %arg4[%c0_6, %c0_7] : memref<512x256xbf16, #tpu.memory_space<vmem>>, vector<512x256xbf16>
    %cst_8 = arith.constant dense<0.000000e+00> : vector<8x256xf32>
    %11 = tpu.matmul %9, %10, %cst_8 {dimension_numbers = #tpu.dot_dimension_numbers<[1], [0], [0], [1], [0, 0, 1, 1], [], []>} : vector<8x512xbf16>, vector<512x256xbf16>, vector<8x256xf32> -> vector<8x256xf32>
    %c0_9 = arith.constant 0 : index
    %c0_10 = arith.constant 0 : index
    %12 = vector.load %arg5[%c0_9, %c0_10] : memref<1x256xf32, #tpu.memory_space<vmem>>, vector<1x256xf32>
    %13 = vector.broadcast %12 : vector<1x256xf32> to vector<8x256xf32>
    %14 = arith.addf %11, %13 : vector<8x256xf32>
    %cst_11 = arith.constant 0.000000e+00 : f32
    %15 = vector.broadcast %cst_11 : f32 to vector<8x256xf32>
    %16 = arith.maximumf %14, %15 : vector<8x256xf32>
    %17 = arith.truncf %16 : vector<8x256xf32> to vector<8x256xbf16>
    %c0_12 = arith.constant 0 : index
    %c0_13 = arith.constant 0 : index
    %18 = vector.load %arg6[%c0_12, %c0_13] : memref<256x128xbf16, #tpu.memory_space<vmem>>, vector<256x128xbf16>
    %cst_14 = arith.constant dense<0.000000e+00> : vector<8x128xf32>
    %19 = tpu.matmul %17, %18, %cst_14 {dimension_numbers = #tpu.dot_dimension_numbers<[1], [0], [0], [1], [0, 0, 1, 1], [], []>} : vector<8x256xbf16>, vector<256x128xbf16>, vector<8x128xf32> -> vector<8x128xf32>
    %c0_15 = arith.constant 0 : index
    %c0_16 = arith.constant 0 : index
    %20 = vector.load %arg7[%c0_15, %c0_16] : memref<1x128xf32, #tpu.memory_space<vmem>>, vector<1x128xf32>
    %21 = vector.broadcast %20 : vector<1x128xf32> to vector<8x128xf32>
    %22 = arith.addf %19, %21 : vector<8x128xf32>
    %c0_17 = arith.constant 0 : index
    %c0_18 = arith.constant 0 : index
    %23 = vector.load %arg8[%c0_17, %c0_18] : memref<8x128xf32, #tpu.memory_space<vmem>>, vector<8x128xf32>
    tpu.vector_store %arg8[%c0_17, %c0_18], %22 {strides = array<i32>} : memref<8x128xf32, #tpu.memory_space<vmem>>, vector<8x128xf32>,
    return
  }
  func.func @transform_0(%arg0: i32) -> (i32, i32) {
    %c0_i32 = arith.constant 0 : i32
    %c0_i32_0 = arith.constant 0 : i32
    return %arg0, %c0_i32 : i32, i32
  }
  func.func @transform_1(%arg0: i32) -> (i32, i32) {
    %c0_i32 = arith.constant 0 : i32
    %c0_i32_0 = arith.constant 0 : i32
    %c0_i32_1 = arith.constant 0 : i32
    return %c0_i32, %c0_i32_0 : i32, i32
  }
  func.func @transform_2(%arg0: i32) -> (i32, i32) {
    %c0_i32 = arith.constant 0 : i32
    %c0_i32_0 = arith.constant 0 : i32
    %c0_i32_1 = arith.constant 0 : i32
    return %c0_i32, %c0_i32_0 : i32, i32
  }
  func.func @transform_3(%arg0: i32) -> (i32, i32) {
    %c0_i32 = arith.constant 0 : i32
    %c0_i32_0 = arith.constant 0 : i32
    %c0_i32_1 = arith.constant 0 : i32
    return %c0_i32, %c0_i32_0 : i32, i32
  }
  func.func @transform_4(%arg0: i32) -> (i32, i32) {
    %c0_i32 = arith.constant 0 : i32
    %c0_i32_0 = arith.constant 0 : i32
    %c0_i32_1 = arith.constant 0 : i32
    return %c0_i32, %c0_i32_0 : i32, i32
  }
  func.func @transform_5(%arg0: i32) -> (i32, i32) {
    %c0_i32 = arith.constant 0 : i32
    %c0_i32_0 = arith.constant 0 : i32
    %c0_i32_1 = arith.constant 0 : i32
    return %c0_i32, %c0_i32_0 : i32, i32
  }
  func.func @transform_6(%arg0: i32) -> (i32, i32) {
    %c0_i32 = arith.constant 0 : i32
    %c0_i32_0 = arith.constant 0 : i32
    %c0_i32_1 = arith.constant 0 : i32
    return %c0_i32, %c0_i32_0 : i32, i32
  }
  func.func @transform_7(%arg0: i32) -> (i32, i32) {
    %c0_i32 = arith.constant 0 : i32
    %c0_i32_0 = arith.constant 0 : i32
    return %arg0, %c0_i32 : i32, i32
  }
}

</mosaic_0001>

<bundles_post_ra>
// kernel: dqn_forward.1
= control target key start
LH: loop header
LB: loop body
LE: loop exit
PB: predicated region body
PF: predicated region fallthrough
CT: control target
= control target key end

     0   :  { %12 = vsyncpa [#allocation3], 0  ;;  %s1542_s0 = inlined_call_operand.hbm [shape: f32[8,64], index: 0, kind: input, shape index: {}]   ;;  %s1543_s1 = inlined_call_operand.hbm [shape: bf16[64,512], index: 1, kind: input, shape index: {}]   ;;  %s1544_s2 = inlined_call_operand.hbm [shape: f32[1,512], index: 2, kind: input, shape index: {}]   ;;  %s1545_s3 = inlined_call_operand.hbm [shape: bf16[512,256], index: 3, kind: input, shape index: {}]   ;;  %s1546_s4 = inlined_call_operand.vmem [shape: f32[1,256], index: 4, kind: input, shape index: {}]   ;;  %s1547_s5 = inlined_call_operand.hbm [shape: bf16[256,128], index: 5, kind: input, shape index: {}]   ;;  %s1548_s6 = inlined_call_operand.vmem [shape: f32[1,128], index: 6, kind: input, shape index: {}]   ;;  %s1549_s7 = inlined_call_operand.hbm [shape: f32[8,128], index: 7, kind: output, shape index: {}]  }
   0x1   :  { %13 = vsyncpa [#allocation6], 0 }
   0x2   :  { %14 = vsyncpa [#allocation9], 0 }
   0x3   :  { %15 = vsyncpa [#allocation4], 0  ;;  %s1395_s24 = smov [#allocation5]   ;;  %s1255_s28 = scalar_lea.hbm %s1543_s1, 2048 }
   0x4   :  { %s31_s25 = sshll.u32 %s1395_s24, 4  ;;  %p1256_p0 = scmp.ne.s32.totalorder %s1543_s1, %s1255_s28  ;;  %s32_s25 = int_to_ptr.vmem [resolvable:$true] %s31_s25 }
   0x5   :  { %p1259_p1 = scmp.lt.u32.totalorder %s1255_s28, %s1543_s1 }
   0x7   :  { %p1261_p2 = pnand %p1259_p1, %p1256_p0 }
   0x9   :  { %1264 = shalt.err (!%p1261_p2)
}
   0xa   :  { %s1265_s10 = scalar_lea.vmem %s32_s25, 2048  ;;  %p1270_p4 = scmp.lt.s32.totalorder %s32_s25, %s32_s25 }
   0xb   :  { %p1266_p3 = scmp.ne.s32.totalorder %s32_s25, %s1265_s10  ;;  %p1271_p5 = scmp.lt.s32.totalorder %s1265_s10, %s1265_s10 }
   0xd   :  { %p1272_p6 = por %p1271_p5, %p1270_p4 }
   0xf   :  { %p1273_p7 = pnand %p1272_p6, %p1266_p3 }
  0x11   :  { %1276 = shalt.err (!%p1273_p7)
}
  0x12   :  { %s1396_s11 = smov 256   ;;  %s1397_s12 = smov 16  }
  0x13   :  { %37 = dma.hbm_to_vmem [thread:$0]  %s1543_s1, 2048, %s32_s25, [#allocation6], %s1396_s11, %s1396_s11, %s1397_s12  }
  0x14   :  { %s1398_s15 = smov [#allocation8]   ;;  %s1277_s19 = scalar_lea.hbm %s1545_s3, 8192 }
  0x15   :  { %s53_s16 = sshll.u32 %s1398_s15, 4  ;;  %p1278_p8 = scmp.ne.s32.totalorder %s1545_s3, %s1277_s19  ;;  %s54_s16 = int_to_ptr.vmem [resolvable:$true] %s53_s16 }
  0x16   :  { %p1281_p9 = scmp.lt.u32.totalorder %s1277_s19, %s1545_s3 }
  0x18   :  { %p1283_p10 = pnand %p1281_p9, %p1278_p8 }
  0x1a   :  { %1286 = shalt.err (!%p1283_p10)
}
  0x1b   :  { %s1287_s24 = scalar_lea.vmem %s54_s16, 8192  ;;  %p1292_p12 = scmp.lt.s32.totalorder %s54_s16, %s54_s16 }
  0x1c   :  { %p1288_p11 = scmp.ne.s32.totalorder %s54_s16, %s1287_s24  ;;  %p1293_p13 = scmp.lt.s32.totalorder %s1287_s24, %s1287_s24 }
  0x1e   :  { %p1294_p0 = por %p1293_p13, %p1292_p12 }
  0x20   :  { %p1295_p1 = pnand %p1294_p0, %p1288_p11 }
  0x22   :  { %1298 = shalt.err (!%p1295_p1)
}
  0x23   :  { %s1399_s1 = smov 128   ;;  %s1400_s25 = smov 8  }
  0x24   :  { %59 = dma.hbm_to_vmem [thread:$0]  %s1545_s3, 8192, %s54_s16, [#allocation9], %s1399_s1, %s1399_s1, %s1400_s25  }
  0x25   :  { %s1401_s28 = smov [#allocation2]   ;;  %s1402_s30 = smov [#allocation7]  }
  0x26   :  { %s22_s29 = sshll.u32 %s1401_s28, 4  ;;  %s44_s8 = sshll.u32 %s1402_s30, 4  ;;  %s23_s29 = int_to_ptr.vmem [resolvable:$true] %s22_s29  ;;  %s45_s8 = int_to_ptr.vmem [resolvable:$true] %s44_s8 }
  0x27   :  { %s1299_s11 = scalar_lea.hbm %s1542_s0, 128 }
  0x28   :  { %p1300_p2 = scmp.ne.s32.totalorder %s1542_s0, %s1299_s11  ;;  %p1303_p3 = scmp.lt.u32.totalorder %s1299_s11, %s1542_s0 }
  0x2a   :  { %p1305_p4 = pnand %p1303_p3, %p1300_p2 }
  0x2c   :  { %1308 = shalt.err (!%p1305_p4)
}
  0x2d   :  { %s1309_s3 = scalar_lea.vmem %s23_s29, 128  ;;  %p1314_p6 = scmp.lt.s32.totalorder %s23_s29, %s23_s29 }
  0x2e   :  { %p1310_p5 = scmp.ne.s32.totalorder %s23_s29, %s1309_s3  ;;  %p1315_p7 = scmp.lt.s32.totalorder %s1309_s3, %s1309_s3 }
  0x30   :  { %p1316_p8 = por %p1315_p7, %p1314_p6 }
  0x32   :  { %p1317_p9 = pnand %p1316_p8, %p1310_p5 }
  0x34   :  { %1320 = shalt.err (!%p1317_p9)
}
  0x35   :  { %25 = dma.hbm_to_vmem [thread:$0]  %s1542_s0, 128, %s23_s29, [#allocation3]  }
  0x36   :  { %s1321_s20 = scalar_lea.hbm %s1544_s2, 64 }
  0x37   :  { %p1322_p10 = scmp.ne.s32.totalorder %s1544_s2, %s1321_s20  ;;  %p1325_p11 = scmp.lt.u32.totalorder %s1321_s20, %s1544_s2 }
  0x39   :  { %p1327_p12 = pnand %p1325_p11, %p1322_p10 }
  0x3b   :  { %1330 = shalt.err (!%p1327_p12)
}
  0x3c   :  { %s1331_s1 = scalar_lea.vmem %s45_s8, 64  ;;  %p1336_p0 = scmp.lt.s32.totalorder %s45_s8, %s45_s8 }
  0x3d   :  { %p1332_p13 = scmp.ne.s32.totalorder %s45_s8, %s1331_s1  ;;  %p1337_p1 = scmp.lt.s32.totalorder %s1331_s1, %s1331_s1 }
  0x3f   :  { %p1338_p2 = por %p1337_p1, %p1336_p0 }
  0x41   :  { %p1339_p3 = pnand %p1338_p2, %p1332_p13 }
  0x43   :  { %1342 = shalt.err (!%p1339_p3)
}
  0x44   :  { %47 = dma.hbm_to_vmem [thread:$0]  %s1544_s2, 64, %s45_s8, [#allocation6]  }
  0x45   :  { %s1403_s26 = smov [#allocation10]   ;;  %s1343_s30 = scalar_lea.hbm %s1547_s5, 2048 }
  0x46   :  { %s67_s27 = sshll.u32 %s1403_s26, 4  ;;  %p1344_p4 = scmp.ne.s32.totalorder %s1547_s5, %s1343_s30  ;;  %s68_s27 = int_to_ptr.vmem [resolvable:$true] %s67_s27 }
  0x47   :  { %p1347_p5 = scmp.lt.u32.totalorder %s1343_s30, %s1547_s5 }
  0x49   :  { %p1349_p6 = pnand %p1347_p5, %p1344_p4 }
  0x4b   :  { %1352 = shalt.err (!%p1349_p6)
}
  0x4c   :  { %s1353_s13 = scalar_lea.vmem %s68_s27, 2048  ;;  %p1358_p8 = scmp.lt.s32.totalorder %s68_s27, %s68_s27 }
  0x4d   :  { %p1354_p7 = scmp.ne.s32.totalorder %s68_s27, %s1353_s13  ;;  %p1359_p9 = scmp.lt.s32.totalorder %s1353_s13, %s1353_s13 }
  0x4f   :  { %p1360_p10 = por %p1359_p9, %p1358_p8 }
  0x51   :  { %p1361_p11 = pnand %p1360_p10, %p1354_p7 }
  0x53   :  { %1364 = shalt.err (!%p1361_p11)
}
  0x54   :  { %s1404_s2 = smov 64   ;;  %s1405_s8 = smov 4  }
  0x55   :  { %73 = dma.hbm_to_vmem [thread:$0]  %s1547_s5, 2048, %s68_s27, [#allocation9], %s1404_s2, %s1404_s2, %s1405_s8  }
  0x56   :  { %1387 = dma.done.wait [#allocation3], 128  }
  0x57   :  { %1388 = vsyncadd [#allocation3], 4294967168 }
  0x58   :  { %1389 = dma.done.wait [#allocation6], 2112  }
  0x59   :  { %1390 = vsyncadd [#allocation6], 4294965184 }
  0x5a   :  { %1391 = dma.done.wait [#allocation9], 10240  }
  0x5b   :  { %1392 = vsyncadd [#allocation9], 4294957056  ;;  %v1406_v0 = vmov 0   ;;  %v1119_v1 = vld [vmem:[#allocation5 + $0x4] ss:$16 sps:$4 sm:$0xff]   ;;  %v92_v9 = vld [vmem:[#allocation2] sm:$0xff] }
  0x5c   :  { %248 = vmatprep.mubr.bf16.mxu0 %v1406_v0  ;;  %v1121_v2 = vld [vmem:[#allocation5] ss:$16 sps:$4 sm:$0xff]   ;;  %216 = vmatprep.subr.bf16.mxu0 %v1119_v1  ;;  %v1122_v3 = vld [vmem:[#allocation5 + $0x24] ss:$16 sps:$4 sm:$0xff]   ;;  %v1133_v10 = vld [vmem:[#allocation5 + $0xc] ss:$16 sps:$4 sm:$0xff]   ;;  %v93_v14 = vpack.c.bf16 %v92_v9, %v92_v9 }
  0x5d   :  { %217 = vmatpush1.bf16.msra.mxu0 %v1121_v2  ;;  %v1124_v4 = vld [vmem:[#allocation5 + $0x20] ss:$16 sps:$4 sm:$0xff]   ;;  %v1125_v5 = vld [vmem:[#allocation5 + $0x44] ss:$16 sps:$4 sm:$0xff]   ;;  %v1131_v15 = vld [vmem:[#allocation5 + $0x8] ss:$16 sps:$4 sm:$0xff]  }
  0x5e   :  { %218 = vmatprep.subr.bf16.mxu0 %v1122_v3  ;;  %v1127_v6 = vld [vmem:[#allocation5 + $0x40] ss:$16 sps:$4 sm:$0xff]   ;;  %v1128_v7 = vld [vmem:[#allocation5 + $0x64] ss:$16 sps:$4 sm:$0xff]   ;;  %vm212_vm0 = vcmask 523264   ;;  %s1407_s17 = smov [#allocation11]  }
  0x5f   :  { %v1130_v8 = vld [vmem:[#allocation5 + $0x60] ss:$16 sps:$4 sm:$0xff]   ;;  %v1145_v12 = vld [vmem:[#allocation8] ss:$8 sps:$4 sm:$0xff]   ;;  %v1148_v16 = vld [vmem:[#allocation8 + $0x10] ss:$8 sps:$4 sm:$0xff]  }
  0x60   :  { %v1143_v11 = vld [vmem:[#allocation8 + $0x4] ss:$8 sps:$4 sm:$0xff]   ;;  %v1146_v13 = vld [vmem:[#allocation8 + $0x14] ss:$8 sps:$4 sm:$0xff]   ;;  %v1136_v17 = vld [vmem:[#allocation5 + $0x2c] ss:$16 sps:$4 sm:$0xff]  }
  0x61   :  { %219 = vmatpush1.bf16.msra.mxu0 %v1124_v4  ;;  %702 = vmatprep.subr.bf16.mxu1 %v1143_v11  ;;  %v1149_v18 = vld [vmem:[#allocation8 + $0x24] ss:$8 sps:$4 sm:$0xff]   ;;  %v1151_v20 = vld [vmem:[#allocation8 + $0x20] ss:$8 sps:$4 sm:$0xff]   ;;  %v1152_v21 = vld [vmem:[#allocation8 + $0x34] ss:$8 sps:$4 sm:$0xff]  }
  0x62   :  { %220 = vmatprep.subr.bf16.mxu0 %v1125_v5  ;;  %703 = vmatpush1.bf16.msra.mxu1 %v1145_v12  ;;  %v1134_v19 = vld [vmem:[#allocation5 + $0x28] ss:$16 sps:$4 sm:$0xff]   ;;  %v1139_v22 = vld [vmem:[#allocation5 + $0x4c] ss:$16 sps:$4 sm:$0xff]   ;;  %s970_s18 = sshll.u32 %s1407_s17, 4  ;;  %s971_s18 = int_to_ptr.vmem [resolvable:$true] %s970_s18 }
  0x63   :  { %704 = vmatprep.subr.bf16.mxu1 %v1146_v13  ;;  %v1154_v23 = vld [vmem:[#allocation8 + $0x30] ss:$8 sps:$4 sm:$0xff]   ;;  %v1137_v24 = vld [vmem:[#allocation5 + $0x48] ss:$16 sps:$4 sm:$0xff]   ;;  %v1160_v28 = vld [vmem:[#allocation8 + $0x40] ss:$8 sps:$4 sm:$0xff]   ;;  %p1370_p13 = scmp.lt.s32.totalorder %s971_s18, %s971_s18 }
  0x64   :  { %v1155_v25 = vld [vmem:[#allocation8 + $0x44] ss:$8 sps:$4 sm:$0xff]   ;;  %v1142_v26 = vld [vmem:[#allocation5 + $0x6c] ss:$16 sps:$4 sm:$0xff]   ;;  %v1161_v29 = vld [vmem:[#allocation8 + $0x54] ss:$8 sps:$4 sm:$0xff]  }
  0x65   :  { %221 = vmatpush1.bf16.msra.mxu0 %v1127_v6  ;;  %v1140_v27 = vld [vmem:[#allocation5 + $0x68] ss:$16 sps:$4 sm:$0xff]   ;;  %v1166_v31 = vld [vmem:[#allocation8 + $0x50] ss:$8 sps:$4 sm:$0xff]   ;;  %v1157_v32 = vld [vmem:[#allocation8 + $0x100] ss:$8 sps:$4 sm:$0xff]  }
  0x66   :  { %222 = vmatprep.subr.bf16.mxu0 %v1128_v7  ;;  %705 = vmatpush1.bf16.msra.mxu1 %v1148_v16  ;;  %v1159_v30 = vld [vmem:[#allocation8 + $0x104] ss:$8 sps:$4 sm:$0xff]   ;;  %v1165_v34 = vld [vmem:[#allocation8 + $0x114] ss:$8 sps:$4 sm:$0xff]   ;;  %v1163_v35 = vld [vmem:[#allocation8 + $0x110] ss:$8 sps:$4 sm:$0xff]  }
  0x67   :  { %706 = vmatprep.subr.bf16.mxu1 %v1149_v18  ;;  %v1167_v33 = vld [vmem:[#allocation8 + $0x64] ss:$8 sps:$4 sm:$0xff]   ;;  %v1172_v36 = vld [vmem:[#allocation8 + $0x60] ss:$8 sps:$4 sm:$0xff]   ;;  %v1173_v37 = vld [vmem:[#allocation8 + $0x74] ss:$8 sps:$4 sm:$0xff]  }
  0x68   :  { %v1171_v38 = vld [vmem:[#allocation8 + $0x124] ss:$8 sps:$4 sm:$0xff]   ;;  %v1178_v39 = vld [vmem:[#allocation8 + $0x70] ss:$8 sps:$4 sm:$0xff]   ;;  %v1169_v40 = vld [vmem:[#allocation8 + $0x120] ss:$8 sps:$4 sm:$0xff]  }
  0x69   :  { %223 = vmatpush1.bf16.msra.mxu0 %v1130_v8  ;;  %v1179_v41 = vld [vmem:[#allocation8 + $0x84] ss:$8 sps:$4 sm:$0xff]   ;;  %v1177_v42 = vld [vmem:[#allocation8 + $0x134] ss:$8 sps:$4 sm:$0xff]   ;;  %v1175_v43 = vld [vmem:[#allocation8 + $0x130] ss:$8 sps:$4 sm:$0xff]  }
  0x6a   :  { %257 = vmatprep.subr.bf16.mxu0 %v1133_v10  ;;  %707 = vmatpush1.bf16.msra.mxu1 %v1151_v20  ;;  %v1183_v44 = vld [vmem:[#allocation8 + $0x144] ss:$8 sps:$4 sm:$0xff]   ;;  %v1184_v45 = vld [vmem:[#allocation8 + $0x80] ss:$8 sps:$4 sm:$0xff]   ;;  %v1185_v46 = vld [vmem:[#allocation8 + $0x94] ss:$8 sps:$4 sm:$0xff]   ;;  %v112_v20 = vlaneseq }
  0x6b   :  { %708 = vmatprep.subr.bf16.mxu1 %v1152_v21  ;;  %v1190_v47 = vld [vmem:[#allocation8 + $0x90] ss:$8 sps:$4 sm:$0xff]   ;;  %v1181_v48 = vld [vmem:[#allocation8 + $0x140] ss:$8 sps:$4 sm:$0xff]   ;;  %v1191_v49 = vld [vmem:[#allocation8 + $0xa4] ss:$8 sps:$4 sm:$0xff]  }
  0x6c   :  { %997 = vmatmul.mubr.msk.bf16.vlgmr.msra.gmra.mrb[0].mxu0 %vm212_vm0, %v93_v14  ;;  %v1189_v50 = vld [vmem:[#allocation8 + $0x154] ss:$8 sps:$4 sm:$0xff]   ;;  %v1196_v51 = vld [vmem:[#allocation8 + $0xa0] ss:$8 sps:$4 sm:$0xff]   ;;  %v1187_v52 = vld [vmem:[#allocation8 + $0x150] ss:$8 sps:$4 sm:$0xff]  }
  0x6d   :  { %258 = vmatpush1.bf16.msra.mxu0 %v1131_v15  ;;  %289 = vmatprep.mubr.bf16.mxu0 %v1406_v0  ;;  %v1197_v53 = vld [vmem:[#allocation8 + $0xb4] ss:$8 sps:$4 sm:$0xff]   ;;  %v1195_v54 = vld [vmem:[#allocation8 + $0x164] ss:$8 sps:$4 sm:$0xff]   ;;  %v1202_v55 = vld [vmem:[#allocation8 + $0xb0] ss:$8 sps:$4 sm:$0xff]  }
  0x6e   :  { %259 = vmatprep.subr.bf16.mxu0 %v1136_v17  ;;  %709 = vmatpush1.bf16.msra.mxu1 %v1154_v23  ;;  %v1193_v56 = vld [vmem:[#allocation8 + $0x160] ss:$8 sps:$4 sm:$0xff]   ;;  %v1203_v57 = vld [vmem:[#allocation8 + $0xc4] ss:$8 sps:$4 sm:$0xff]   ;;  %v1201_v58 = vld [vmem:[#allocation8 + $0x174] ss:$8 sps:$4 sm:$0xff]  }
  0x6f   :  { %710 = vmatprep.subr.bf16.mxu1 %v1155_v25  ;;  %v1208_v59 = vld [vmem:[#allocation8 + $0xc0] ss:$8 sps:$4 sm:$0xff]   ;;  %v1199_v60 = vld [vmem:[#allocation8 + $0x170] ss:$8 sps:$4 sm:$0xff]   ;;  %v1209_v61 = vld [vmem:[#allocation8 + $0xd4] ss:$8 sps:$4 sm:$0xff]  }
  0x70   :  { %v1207_v62 = vld [vmem:[#allocation8 + $0x184] ss:$8 sps:$4 sm:$0xff]   ;;  %v1214_v63 = vld [vmem:[#allocation8 + $0xd0] ss:$8 sps:$4 sm:$0xff]   ;;  %v1205_v0 = vld [vmem:[#allocation8 + $0x180] ss:$8 sps:$4 sm:$0xff]  }
  0x71   :  { %260 = vmatpush1.bf16.msra.mxu0 %v1134_v19  ;;  %v1213_v1 = vld [vmem:[#allocation8 + $0x194] ss:$8 sps:$4 sm:$0xff]   ;;  %v1211_v2 = vld [vmem:[#allocation8 + $0x190] ss:$8 sps:$4 sm:$0xff]   ;;  %v1215_v3 = vld [vmem:[#allocation8 + $0xe4] ss:$8 sps:$4 sm:$0xff]  }
  0x72   :  { %261 = vmatprep.subr.bf16.mxu0 %v1139_v22  ;;  %711 = vmatpush1.bf16.msra.mxu1 %v1160_v28  ;;  %v1219_v4 = vld [vmem:[#allocation8 + $0x1a4] ss:$8 sps:$4 sm:$0xff]   ;;  %v1217_v5 = vld [vmem:[#allocation8 + $0x1a0] ss:$8 sps:$4 sm:$0xff]   ;;  %v1221_v7 = vld [vmem:[#allocation8 + $0xf4] ss:$8 sps:$4 sm:$0xff]  }
  0x73   :  { %712 = vmatprep.subr.bf16.mxu1 %v1161_v29  ;;  %v1220_v6 = vld [vmem:[#allocation8 + $0xe0] ss:$8 sps:$4 sm:$0xff]   ;;  %v1225_v8 = vld [vmem:[#allocation8 + $0x1b4] ss:$8 sps:$4 sm:$0xff]   ;;  %v1223_v9 = vld [vmem:[#allocation8 + $0x1b0] ss:$8 sps:$4 sm:$0xff]  }
  0x74   :  { %v1226_v10 = vld [vmem:[#allocation8 + $0xf0] ss:$8 sps:$4 sm:$0xff]   ;;  %v1229_v11 = vld [vmem:[#allocation8 + $0x1c4] ss:$8 sps:$4 sm:$0xff]   ;;  %v1227_v12 = vld [vmem:[#allocation8 + $0x1c0] ss:$8 sps:$4 sm:$0xff]  }
  0x75   :  { %262 = vmatpush1.bf16.msra.mxu0 %v1137_v24  ;;  %v1232_v13 = vld [vmem:[#allocation8 + $0x1d4] ss:$8 sps:$4 sm:$0xff]   ;;  %v1235_v15 = vld [vmem:[#allocation8 + $0x1e4] ss:$8 sps:$4 sm:$0xff]   ;;  %v1233_v16 = vld [vmem:[#allocation8 + $0x1e0] ss:$8 sps:$4 sm:$0xff]  }
  0x76   :  { %263 = vmatprep.subr.bf16.mxu0 %v1142_v26  ;;  %713 = vmatpush1.bf16.msra.mxu1 %v1166_v31  ;;  %v1238_v17 = vld [vmem:[#allocation8 + $0x1f4] ss:$8 sps:$4 sm:$0xff]   ;;  %v1236_v18 = vld [vmem:[#allocation8 + $0x1f0] ss:$8 sps:$4 sm:$0xff]   ;;  %v1239_v19 = vld [vmem:[#allocation10 + $0x40] sm:$0xff]   ;;  %v1510_v21 = vshrl.u32 %v112_v20, 7 }
  0x77   :  { %714 = vmatprep.subr.bf16.mxu1 %v1167_v33  ;;  %v110_v23 = vld [vmem:[#allocation7] sm:$0xf]  ;;  %s1365_s19 = scalar_lea.vmem %s971_s18, 128 }
  0x78   :  { %v114_v22 = vsub.s32 0, %v1510_v21  ;;  %v118_v24 = vsub.s32 1, %v1510_v21  ;;  %p1366_p12 = scmp.ne.s32.totalorder %s971_s18, %s1365_s19  ;;  %p1371_p0 = scmp.lt.s32.totalorder %s1365_s19, %s1365_s19 }
  0x79   :  { %264 = vmatpush1.bf16.msra.mxu0 %v1140_v27 }
  0x7a   :  { %743 = vmatprep.subr.bf16.mxu0 %v1159_v30  ;;  %715 = vmatpush1.bf16.msra.mxu1 %v1172_v36  ;;  %v115_v25 = vrot.slane %v110_v23, %v114_v22  ;;  %v119_v26 = vrot.slane %v110_v23, %v118_v24  ;;  %p1372_p1 = por %p1371_p0, %p1370_p13 }
  0x7b   :  { %716 = vmatprep.subr.bf16.mxu1 %v1173_v37  ;;  %v1240_v37 = vld [vmem:[#allocation10] sm:$0xff]  }
  0x7c   :  { %998 = vmatmul.mubr.msk.bf16.vlgmr.msra.gmra.mrb[4].mxu0 %vm212_vm0, %v93_v14  ;;  %v1230_v14 = vld [vmem:[#allocation8 + $0x1d0] ss:$8 sps:$4 sm:$0xff]   ;;  %p1373_p2 = pnand %p1372_p1, %p1366_p12 }
  0x7d   :  { %744 = vmatpush1.bf16.msra.mxu0 %v1157_v32 }
  0x7e   :  { %745 = vmatprep.subr.bf16.mxu0 %v1165_v34  ;;  %717 = vmatpush1.bf16.msra.mxu1 %v1178_v39  ;;  %v122_v39 = vsub.s32 2, %v1510_v21 }
  0x7f   :  { %718 = vmatprep.subr.bf16.mxu1 %v1179_v41  ;;  %v1242_v41 = vld [vmem:[#allocation10 + $0x8] sm:$0xff]  }
  0x81   :  { %746 = vmatpush1.bf16.msra.mxu0 %v1163_v35 }
  0x82   :  { %747 = vmatprep.subr.bf16.mxu0 %v1171_v38  ;;  %719 = vmatpush1.bf16.msra.mxu1 %v1184_v45  ;;  %v1241_v38 = vld [vmem:[#allocation10 + $0x48] sm:$0xff]  }
  0x83   :  { %720 = vmatprep.subr.bf16.mxu1 %v1185_v46 }
  0x85   :  { %748 = vmatpush1.bf16.msra.mxu0 %v1169_v40  ;;  %v126_v40 = vsub.s32 3, %v1510_v21  ;;  %v1063_v21 = vld [vmem:[%s1548_s6] ss:$0 sm:$0xff] }
  0x86   :  { %749 = vmatprep.subr.bf16.mxu0 %v1177_v42  ;;  %721 = vmatpush1.bf16.msra.mxu1 %v1190_v47  ;;  %v123_v42 = vrot.slane %v110_v23, %v122_v39 }
  0x87   :  { %722 = vmatprep.subr.bf16.mxu1 %v1191_v49 }
  0x89   :  { %750 = vmatpush1.bf16.msra.mxu0 %v1175_v43  ;;  %v127_v43 = vrot.slane %v110_v23, %v126_v40 }
  0x8a   :  { %751 = vmatprep.subr.bf16.mxu0 %v1183_v44  ;;  %723 = vmatpush1.bf16.msra.mxu1 %v1196_v51 }
  0x8b   :  { %724 = vmatprep.subr.bf16.mxu1 %v1197_v53 }
  0x8d   :  { %752 = vmatpush1.bf16.msra.mxu0 %v1181_v48 }
  0x8e   :  { %753 = vmatprep.subr.bf16.mxu0 %v1189_v50  ;;  %725 = vmatpush1.bf16.msra.mxu1 %v1202_v55  ;;  %v1244_v55 = vld [vmem:[#allocation10 + $0x10] sm:$0xff]  }
  0x8f   :  { %726 = vmatprep.subr.bf16.mxu1 %v1203_v57  ;;  %v1246_v57 = vld [vmem:[#allocation10 + $0x18] sm:$0xff]  }
  0x91   :  { %754 = vmatpush1.bf16.msra.mxu0 %v1187_v52 }
  0x92   :  { %755 = vmatprep.subr.bf16.mxu0 %v1195_v54  ;;  %727 = vmatpush1.bf16.msra.mxu1 %v1208_v59  ;;  %v1243_v54 = vld [vmem:[#allocation10 + $0x50] sm:$0xff]   ;;  %v1248_v59 = vld [vmem:[#allocation10 + $0x20] sm:$0xff]  }
  0x93   :  { %728 = vmatprep.subr.bf16.mxu1 %v1209_v61  ;;  %v1250_v61 = vld [vmem:[#allocation10 + $0x28] sm:$0xff]  }
  0x95   :  { %756 = vmatpush1.bf16.msra.mxu0 %v1193_v56  ;;  %v1245_v56 = vld [vmem:[#allocation10 + $0x58] sm:$0xff]  }
  0x96   :  { %757 = vmatprep.subr.bf16.mxu0 %v1201_v58  ;;  %729 = vmatpush1.bf16.msra.mxu1 %v1214_v63  ;;  %v1247_v58 = vld [vmem:[#allocation10 + $0x60] sm:$0xff]   ;;  %v1252_v63 = vld [vmem:[#allocation10 + $0x30] sm:$0xff]  }
  0x97   :  { %730 = vmatprep.subr.bf16.mxu1 %v1215_v3 }
  0x99   :  { %758 = vmatpush1.bf16.msra.mxu0 %v1199_v60  ;;  %v1249_v60 = vld [vmem:[#allocation10 + $0x68] sm:$0xff]  }
  0x9a   :  { %759 = vmatprep.subr.bf16.mxu0 %v1207_v62  ;;  %731 = vmatpush1.bf16.msra.mxu1 %v1220_v6  ;;  %v1251_v62 = vld [vmem:[#allocation10 + $0x70] sm:$0xff]  }
  0x9b   :  { %732 = vmatprep.subr.bf16.mxu1 %v1221_v7  ;;  %v370_v6 = vld [vmem:[%s1546_s4] sm:$0x3] }
  0x9c   :  { %v375_v7 = vrot.slane %v370_v6, %v114_v22 }
  0x9d   :  { %760 = vmatpush1.bf16.msra.mxu0 %v1205_v0  ;;  %v1253_v0 = vld [vmem:[#allocation10 + $0x78] sm:$0xff]  }
  0x9e   :  { %761 = vmatprep.subr.bf16.mxu0 %v1213_v1  ;;  %733 = vmatpush1.bf16.msra.mxu1 %v1226_v10  ;;  %v1254_v1 = vld [vmem:[#allocation10 + $0x38] sm:$0xff]  }
  0x9f   :  { %1080 = vmatprep.subr.bf16.mxu1 %v1239_v19 }
  0xa1   :  { %762 = vmatpush1.bf16.msra.mxu0 %v1211_v2 }
  0xa2   :  { %763 = vmatprep.subr.bf16.mxu0 %v1219_v4 }
  0xa5   :  { %764 = vmatpush1.bf16.msra.mxu0 %v1217_v5 }
  0xa6   :  { %765 = vmatprep.subr.bf16.mxu0 %v1225_v8  ;;  %v379_v8 = vrot.slane %v370_v6, %v118_v24 }
  0xa9   :  { %766 = vmatpush1.bf16.msra.mxu0 %v1223_v9 }
  0xaa   :  { %767 = vmatprep.subr.bf16.mxu0 %v1229_v11 }
  0xad   :  { %768 = vmatpush1.bf16.msra.mxu0 %v1227_v12 }
  0xae   :  { %769 = vmatprep.subr.bf16.mxu0 %v1232_v13 }
  0xb1   :  { %770 = vmatpush1.bf16.msra.mxu0 %v1230_v14 }
  0xb2   :  { %771 = vmatprep.subr.bf16.mxu0 %v1235_v15 }
  0xb5   :  { %772 = vmatpush1.bf16.msra.mxu0 %v1233_v16 }
  0xb6   :  { %773 = vmatprep.subr.bf16.mxu0 %v1238_v17 }
  0xb9   :  { %774 = vmatpush1.bf16.msra.mxu0 %v1236_v18 }
 0x13f   :  { %v250_v27 = vpop.f32.mrb[0].mxu0 }
 0x140   :  { %v251_v28 = vadd.f32 %v250_v27, %v115_v25  ;;  %v252_v29 = vpop.f32.mrb[1].mxu0 }
 0x141   :  { %v253_v30 = vadd.f32 %v252_v29, %v119_v26  ;;  %v254_v31 = vpop.f32.mrb[2].mxu0 }
 0x142   :  { %v298_v32 = vmax.f32 %v251_v28, 0.0  ;;  %v255_v33 = vpop.f32.mrb[3].mxu0 }
 0x143   :  { %v299_v34 = vmax.f32 %v253_v30, 0.0 }
 0x144   :  { %v302_v35 = vpack.c.bf16 %v298_v32, %v298_v32 }
 0x145   :  { %v303_v36 = vpack.c.bf16 %v299_v34, %v299_v34 }
 0x147   :  { %734 = vmatprep.mubr.bf16.mxu1 %v303_v36 }
 0x148   :  { %735 = vmatmul.mubr.bf16.vlgmr.msra.gmra.mrb[0].mxu1 %v302_v35 }
 0x149   :  { %1081 = vmatpush3.bf16.msra.mxu1 %v1240_v37 }
 0x14a   :  { %1082 = vmatprep.subr.bf16.mxu1 %v1241_v38 }
 0x14d   :  { %1083 = vmatpush3.bf16.msra.mxu1 %v1242_v41 }
 0x14e   :  { %1084 = vmatprep.subr.bf16.mxu1 %v1243_v54 }
 0x14f   :  { %v291_v44 = vpop.f32.mrb[4].mxu0 }
 0x150   :  { %v292_v45 = vadd.f32 %v291_v44, %v123_v42  ;;  %v293_v46 = vpop.f32.mrb[5].mxu0 }
 0x151   :  { %v294_v47 = vadd.f32 %v293_v46, %v127_v43  ;;  %v295_v48 = vpop.f32.mrb[6].mxu0  ;;  %1085 = vmatpush3.bf16.msra.mxu1 %v1244_v55 }
 0x152   :  { %v300_v49 = vmax.f32 %v292_v45, 0.0  ;;  %v296_v50 = vpop.f32.mrb[7].mxu0  ;;  %1086 = vmatprep.subr.bf16.mxu1 %v1245_v56 }
 0x153   :  { %v301_v51 = vmax.f32 %v294_v47, 0.0 }
 0x154   :  { %v304_v53 = vpack.c.bf16 %v300_v49, %v300_v49 }
 0x155   :  { %v305_v52 = vpack.c.bf16 %v301_v51, %v301_v51  ;;  %1087 = vmatpush3.bf16.msra.mxu1 %v1246_v57 }
 0x156   :  { %1088 = vmatprep.subr.bf16.mxu1 %v1247_v58 }
 0x157   :  { %775 = vmatprep.mubr.bf16.mxu0 %v305_v52 }
 0x158   :  { %776 = vmatmul.mubr.bf16.vlgmr.msra.gmra.mrb[8].mxu0 %v304_v53 }
 0x159   :  { %1089 = vmatpush3.bf16.msra.mxu1 %v1248_v59 }
 0x15a   :  { %1090 = vmatprep.subr.bf16.mxu1 %v1249_v60 }
 0x15d   :  { %1091 = vmatpush3.bf16.msra.mxu1 %v1250_v61 }
 0x15e   :  { %1092 = vmatprep.subr.bf16.mxu1 %v1251_v62 }
 0x161   :  { %1093 = vmatpush3.bf16.msra.mxu1 %v1252_v63 }
 0x162   :  { %1094 = vmatprep.subr.bf16.mxu1 %v1253_v0 }
 0x165   :  { %1095 = vmatpush3.bf16.msra.mxu1 %v1254_v1 }
 0x21b   :  { %v736_v2 = vpop.f32.mrb[0].mxu1 }
 0x21c   :  { %v738_v3 = vpop.f32.mrb[1].mxu1  ;;  %v737_v9 = vadd.f32 %v736_v2, %v375_v7 }
 0x21d   :  { %v740_v4 = vpop.f32.mrb[2].mxu1  ;;  %v739_v10 = vadd.f32 %v738_v3, %v379_v8 }
 0x21e   :  { %v741_v5 = vpop.f32.mrb[3].mxu1 }
 0x22b   :  { %v777_v11 = vpop.f32.mrb[8].mxu0 }
 0x22c   :  { %v778_v12 = vadd.f32 %v777_v11, %v737_v9  ;;  %v779_v13 = vpop.f32.mrb[9].mxu0 }
 0x22d   :  { %v780_v14 = vadd.f32 %v779_v13, %v739_v10  ;;  %v781_v15 = vpop.f32.mrb[10].mxu0 }
 0x22e   :  { %v784_v16 = vmax.f32 %v778_v12, 0.0  ;;  %v782_v17 = vpop.f32.mrb[11].mxu0 }
 0x22f   :  { %v785_v18 = vmax.f32 %v780_v14, 0.0 }
 0x230   :  { %v786_v20 = vpack.c.bf16 %v784_v16, %v784_v16 }
 0x231   :  { %v787_v19 = vpack.c.bf16 %v785_v18, %v785_v18 }
 0x233   :  { %955 = vmatprep.mubr.bf16.mxu1 %v787_v19 }
 0x234   :  { %956 = vmatmul.mubr.bf16.vlgmr.msra.gmra.mrb[4].mxu1 %v786_v20 }
 0x307   :  { %v1096_v23 = vpop.f32.mrb[4].mxu1 }
 0x308   :  { %v1097_v22 = vpop.f32.mrb[5].mxu1 }
 0x309   :  { %v1098_v24 = vadd.f32 %v1097_v22, %v1096_v23  ;;  %v1099_v25 = vpop.f32.mrb[6].mxu1 }
 0x30a   :  { %v1100_v26 = vpop.f32.mrb[7].mxu1 }
 0x30b   :  { %v958_v27 = vadd.f32 %v1098_v24, %v1063_v21 }
 0x30d   :  { %963 = vst [vmem:[#allocation11] sm:$0xff] %v958_v27 }
 0x30e   :  { %1376 = shalt.err (!%p1373_p2)
}
 0x30f   :  { %s1377_s6 = scalar_lea.hbm %s1549_s7, 128 }
 0x310   :  { %p1378_p3 = scmp.ne.s32.totalorder %s1549_s7, %s1377_s6  ;;  %p1381_p4 = scmp.lt.u32.totalorder %s1377_s6, %s1549_s7 }
 0x312   :  { %p1383_p5 = pnand %p1381_p4, %p1378_p3 }
 0x314   :  { %1386 = shalt.err (!%p1383_p5)
}
 0x315   :  { %973 = dma.vmem_to_hbm [thread:$0]  %s971_s18, 128, %s1549_s7, [#allocation4]  }
 0x316   :  { %1393 = dma.done.wait [#allocation4], 128  }
 0x317   :  { %1394 = vsyncadd [#allocation4], 4294967168 }
 0x318   :  { %977 = vsyncpa [#allocation3], 1 }
 0x319   :  { %978 = vsyncpa [#allocation6], 1 }
 0x31a   :  { %979 = vsyncpa [#allocation9], 1 }
 0x31b   :  { %980 = vsyncpa [#allocation4], 1 }

</bundles_post_ra>
